<compile_context>
chip_gen: v6e
topology: v6e:2x2x1
jax: 0.10.0
libtpu: 0.0.40
codegen_flags: <defaults>
</compile_context>

<pallas_src>
import jax
import jax.numpy as jnp
from jax import lax
from jax.experimental import pallas as pl
from jax.experimental.pallas import tpu as pltpu


def _round_up(v, m):
    return ((v + m - 1) // m) * m


def _resident_w_kernel(x_ref, w_ref, o_ref):
    # x_ref: (tm, K), w_ref: (N, K) held resident in VMEM, o_ref: (tm, N).
    # y = x @ W.T  via dot_general contracting the last dim of both operands.
    o_ref[...] = lax.dot_general(
        x_ref[...],
        w_ref[...],
        dimension_numbers=(((1,), (1,)), ((), ())),
        preferred_element_type=jnp.float32,
    ).astype(o_ref.dtype)


def _kreduce_kernel(x_ref, w_ref, o_ref, acc_ref):
    # x_ref: (tm, tk), w_ref: (tn, tk), reduction over grid axis 2 (K).
    @pl.when(pl.program_id(2) == 0)
    def _():
        acc_ref[...] = jnp.zeros_like(acc_ref)

    acc_ref[...] += lax.dot_general(
        x_ref[...],
        w_ref[...],
        dimension_numbers=(((1,), (1,)), ((), ())),
        preferred_element_type=jnp.float32,
    )

    @pl.when(pl.program_id(2) == pl.num_programs(2) - 1)
    def _():
        o_ref[...] = acc_ref[...].astype(o_ref.dtype)


def fully_connected_patch_embedder(x, w, *, compute_dtype=None):
    """y = x @ w.T  (PyTorch Linear(full_patch_size, hidden, bias=False)).

    x: (..., K)   w: (N, K)   ->   y: (..., N)
    compute_dtype: e.g. jnp.bfloat16 on v6e/v7x for native-rate MXU operands
                   (accumulation stays f32; output keeps x.dtype).
    """
    K = x.shape[-1]
    N, Kw = w.shape
    assert Kw == K, f"weight in-dim {Kw} != input feature dim {K}"

    lead = x.shape[:-1]
    M = 1
    for d in lead:
        M *= d

    out_dtype = x.dtype
    x2d = x.reshape(M, K)
    if compute_dtype is not None:
        x2d = x2d.astype(compute_dtype)
        w = w.astype(compute_dtype)

    in_itemsize = jnp.dtype(x2d.dtype).itemsize
    out_itemsize = jnp.dtype(out_dtype).itemsize

    # ---- tile over M: cap (<=256 rows), multiple of 8, pad M instead of assert.
    tm = min(256, _round_up(M, 8))

    def _stream_bytes(tm_):
        # double-buffered x tile + double-buffered output tile
        return 2 * tm_ * K * in_itemsize + 2 * tm_ * N * out_itemsize

    while tm > 8 and _stream_bytes(tm) > 8 * 1024 * 1024:
        tm = max(8, (tm // 2) // 8 * 8)

    m_pad = _round_up(M, tm)
    if m_pad != M:
        x2d = jnp.pad(x2d, ((0, m_pad - M), (0, 0)))

    # Safe scoped-VMEM limit on all generations (v5e/v6e: 128 MiB, v7x: 64 MiB).
    vmem_limit = 32 * 1024 * 1024

    # Can the whole (double-buffered) weight live in VMEM?  Almost always yes
    # for a patch embedder.
    weight_resident = 2 * N * K * in_itemsize <= 12 * 1024 * 1024

    if weight_resident:
        # ---- Path A: resident weight, single K step, no accumulator. --------
        out2d = pl.pallas_call(
            _resident_w_kernel,
            out_shape=jax.ShapeDtypeStruct((m_pad, N), out_dtype),
            grid_spec=pltpu.PrefetchScalarGridSpec(
                num_scalar_prefetch=0,
                grid=(m_pad // tm,),
                in_specs=[
                    pl.BlockSpec((tm, K), lambda i: (i, 0)),
                    pl.BlockSpec((N, K), lambda i: (0, 0)),  # fetched once, held
                ],
                out_specs=pl.BlockSpec((tm, N), lambda i: (i, 0)),
            ),
            compiler_params=pltpu.CompilerParams(
                dimension_semantics=("parallel",),
                vmem_limit_bytes=vmem_limit,
            ),
        )(x2d, w)
        out2d = out2d[:M]
    else:
        # ---- Path B: tile N and K, f32 accumulator over innermost K axis. ---
        tn = 256 if N >= 256 else _round_up(N, 128)
        tk = 512 if K >= 512 else _round_up(K, 128)
        n_pad = _round_up(N, tn)
        k_pad = _round_up(K, tk)
        if k_pad != K:
            x2d = jnp.pad(x2d, ((0, 0), (0, k_pad - K)))
        if n_pad != N or k_pad != K:
            w = jnp.pad(w, ((0, n_pad - N), (0, k_pad - K)))
        out2d = pl.pallas_call(
            _kreduce_kernel,
            out_shape=jax.ShapeDtypeStruct((m_pad, n_pad), out_dtype),
            grid_spec=pltpu.PrefetchScalarGridSpec(
                num_scalar_prefetch=0,
                grid=(m_pad // tm, n_pad // tn, k_pad // tk),
                in_specs=[
                    pl.BlockSpec((tm, tk), lambda i, j, k: (i, k)),
                    pl.BlockSpec((tn, tk), lambda i, j, k: (j, k)),
                ],
                out_specs=pl.BlockSpec((tm, tn), lambda i, j, k: (i, j)),
                scratch_shapes=[pltpu.VMEM((tm, tn), jnp.float32)],
            ),
            compiler_params=pltpu.CompilerParams(
                dimension_semantics=("parallel", "parallel", "arbitrary"),
                vmem_limit_bytes=vmem_limit,
            ),
        )(x2d, w)
        out2d = out2d[:M, :N]

    return out2d.reshape(*lead, N)


if __name__ == "__main__":
    key = jax.random.PRNGKey(0)
    kx, kw, kx2, kw2 = jax.random.split(key, 4)

    # Shapes implied by the module's forward: x (batch, num_patches, full_patch_size).
    batch, num_patches = 2, 8
    full_patch_size = 256  # e.g. 16x16 patch flattened
    hidden = 128

    x = jax.random.normal(kx, (batch, num_patches, full_patch_size), dtype=jnp.float32)
    bound = 1.0 / (full_patch_size ** 0.5)
    w = jax.random.uniform(
        kw, (hidden, full_patch_size), dtype=jnp.float32, minval=-bound, maxval=bound
    )

    y = jax.block_until_ready(fully_connected_patch_embedder(x, w))
    y_ref = jnp.einsum("bsk,nk->bsn", x, w)
    assert y.shape == (batch, num_patches, hidden)
    assert jnp.allclose(y, y_ref, atol=1e-4, rtol=1e-4)

    # Ragged case: M not a multiple of 8, N not a multiple of 128 (padding path).
    x2 = jax.random.normal(kx2, (3, 5, full_patch_size), dtype=jnp.float32)
    w2 = jax.random.uniform(
        kw2, (96, full_patch_size), dtype=jnp.float32, minval=-bound, maxval=bound
    )
    y2 = jax.block_until_ready(fully_connected_patch_embedder(x2, w2))
    y2_ref = jnp.einsum("bsk,nk->bsn", x2, w2)
    assert y2.shape == (3, 5, 96)
    assert jnp.allclose(y2, y2_ref, atol=1e-4, rtol=1e-4)

    print("KERNEL_OK")
</pallas_src>

<mosaic_0001>
module attributes {stable_mosaic.version = 11 : i64} {
  func.func @_resident_w_kernel(%arg0: i32, %arg1: memref<16x256xf32, #tpu.memory_space<vmem>>, %arg2: memref<128x256xf32, #tpu.memory_space<vmem>>, %arg3: memref<16x128xf32, #tpu.memory_space<vmem>>) attributes {dimension_semantics = [#tpu.dimension_semantics<parallel>], iteration_bounds = array<i64: 1>, scalar_prefetch = 0 : i64, scratch_operands = 0 : i64, tpu.core_type = #tpu.core_type<tc>, window_params = [{transform_indices = @transform_0, window_bounds = array<i64: 16, 256>}, {pipeline_mode = #tpu.pipeline_mode<synchronous>, transform_indices = @transform_1, window_bounds = array<i64: 128, 256>}, {transform_indices = @transform_2, window_bounds = array<i64: 16, 128>}]} {
    %c0 = arith.constant 0 : index
    %c0_0 = arith.constant 0 : index
    %0 = vector.load %arg1[%c0, %c0_0] : memref<16x256xf32, #tpu.memory_space<vmem>>, vector<16x256xf32>
    %c0_1 = arith.constant 0 : index
    %c0_2 = arith.constant 0 : index
    %1 = vector.load %arg2[%c0_1, %c0_2] : memref<128x256xf32, #tpu.memory_space<vmem>>, vector<128x256xf32>
    %cst = arith.constant dense<0.000000e+00> : vector<16x128xf32>
    %2 = tpu.matmul %0, %1, %cst {dimension_numbers = #tpu.dot_dimension_numbers<[1], [1], [0], [0], [0, 0, 1, 0], [], []>} : vector<16x256xf32>, vector<128x256xf32>, vector<16x128xf32> -> vector<16x128xf32>
    %c0_3 = arith.constant 0 : index
    %c0_4 = arith.constant 0 : index
    %3 = vector.load %arg3[%c0_3, %c0_4] : memref<16x128xf32, #tpu.memory_space<vmem>>, vector<16x128xf32>
    tpu.vector_store %arg3[%c0_3, %c0_4], %2 {strides = array<i32>} : memref<16x128xf32, #tpu.memory_space<vmem>>, vector<16x128xf32>,
    return
  }
  func.func @transform_0(%arg0: i32) -> (i32, i32) {
    %c0_i32 = arith.constant 0 : i32
    %c0_i32_0 = arith.constant 0 : i32
    return %arg0, %c0_i32 : i32, i32
  }
  func.func @transform_1(%arg0: i32) -> (i32, i32) {
    %c0_i32 = arith.constant 0 : i32
    %c0_i32_0 = arith.constant 0 : i32
    %c0_i32_1 = arith.constant 0 : i32
    return %c0_i32, %c0_i32_0 : i32, i32
  }
  func.func @transform_2(%arg0: i32) -> (i32, i32) {
    %c0_i32 = arith.constant 0 : i32
    %c0_i32_0 = arith.constant 0 : i32
    return %arg0, %c0_i32 : i32, i32
  }
}

</mosaic_0001>

<bundles_post_ra>
// kernel: tpu_custom_call.1
= control target key start
LH: loop header
LB: loop body
LE: loop exit
PB: predicated region body
PF: predicated region fallthrough
CT: control target
= control target key end

     0   :  { %7 = vsyncpa [#allocation3], 0  ;;  %s307_s0 = inlined_call_operand.hbm [shape: f32[16,256], index: 0, kind: input, shape index: {}]   ;;  %s308_s1 = inlined_call_operand.hbm [shape: f32[128,256], index: 1, kind: input, shape index: {}]   ;;  %s309_s2 = inlined_call_operand.hbm [shape: f32[16,128], index: 2, kind: output, shape index: {}]  }
   0x1   :  { %8 = vsyncpa [#allocation6], 0 }
   0x2   :  { %9 = vsyncpa [#allocation4], 0  ;;  %s276_s9 = smov [#allocation2]  }
   0x3   :  { %s15_s10 = sshll.u32 %s276_s9, 4  ;;  %s16_s10 = int_to_ptr.vmem [resolvable:$true] %s15_s10 }
   0x4   :  { %s218_s11 = scalar_lea.vmem %s16_s10, 512  ;;  %p223_p1 = scmp.lt.s32.totalorder %s16_s10, %s16_s10 }
   0x5   :  { %p219_p0 = scmp.ne.s32.totalorder %s16_s10, %s218_s11  ;;  %p224_p2 = scmp.lt.s32.totalorder %s218_s11, %s218_s11 }
   0x7   :  { %p225_p3 = por %p224_p2, %p223_p1 }
   0x9   :  { %p226_p4 = pnand %p225_p3, %p219_p0 }
   0xb   :  { %229 = shalt.err (!%p226_p4)
}
   0xc   :  { %s277_s12 = smov 256   ;;  %s278_s13 = smov 16  }
   0xd   :  { %21 = dma.hbm_to_vmem [thread:$0]  %s307_s0, 512, %s16_s10, [#allocation3], %s277_s12, %s277_s12, %s278_s13  }
   0xe   :  { %s279_s16 = smov [#allocation5]  }
   0xf   :  { %s27_s17 = sshll.u32 %s279_s16, 4  ;;  %s28_s17 = int_to_ptr.vmem [resolvable:$true] %s27_s17 }
  0x10   :  { %s238_s18 = scalar_lea.vmem %s28_s17, 4096  ;;  %p243_p6 = scmp.lt.s32.totalorder %s28_s17, %s28_s17 }
  0x11   :  { %p239_p5 = scmp.ne.s32.totalorder %s28_s17, %s238_s18  ;;  %p244_p7 = scmp.lt.s32.totalorder %s238_s18, %s238_s18 }
  0x13   :  { %p245_p8 = por %p244_p7, %p243_p6 }
  0x15   :  { %p246_p9 = pnand %p245_p8, %p239_p5 }
  0x17   :  { %249 = shalt.err (!%p246_p9)
}
  0x18   :  { %33 = dma.hbm_to_vmem [thread:$0]  %s308_s1, 4096, %s28_s17, [#allocation6], %s277_s12, %s277_s12, %s278_s13  }
  0x19   :  { %270 = dma.done.wait [#allocation3], 512  }
  0x1a   :  { %271 = vsyncadd [#allocation3], 4294966784 }
  0x1b   :  { %272 = dma.done.wait [#allocation6], 4096  }
  0x1c   :  { %273 = vsyncadd [#allocation6], 4294963200  ;;  %v75_v0 = vld [vmem:[#allocation5 + $0xf8] sm:$0xff]  ;;  %v74_v1 = vld [vmem:[#allocation5 + $0xf0] sm:$0xff]  ;;  %s280_s0 = smov [#allocation7]  }
  0x1d   :  { %v73_v2 = vld [vmem:[#allocation5 + $0xe8] sm:$0xff]  ;;  %76 = vmatprep.subr.mxu0 %v75_v0  ;;  %171 = vmatprep.subr.mxu1 %v75_v0  ;;  %v72_v3 = vld [vmem:[#allocation5 + $0xe0] sm:$0xff]  ;;  %v71_v4 = vld [vmem:[#allocation5 + $0xd8] sm:$0xff]  ;;  %s158_s1 = sshll.u32 %s280_s0, 4  ;;  %s159_s1 = int_to_ptr.vmem [resolvable:$true] %s158_s1 }
  0x1e   :  { %77 = vmatpush1.xpose.msra.mxu0 %v74_v1  ;;  %187 = vmatpush1.xpose.msra.mxu1 %v74_v1  ;;  %v70_v5 = vld [vmem:[#allocation5 + $0xd0] sm:$0xff]  ;;  %v69_v6 = vld [vmem:[#allocation5 + $0xc8] sm:$0xff]  ;;  %v68_v8 = vld [vmem:[#allocation5 + $0xc0] sm:$0xff]  ;;  %s250_s21 = scalar_lea.vmem %s159_s1, 256  ;;  %p255_p11 = scmp.lt.s32.totalorder %s159_s1, %s159_s1 }
  0x1f   :  { %78 = vmatprep.subr.mxu0 %v73_v2  ;;  %172 = vmatprep.subr.mxu1 %v73_v2  ;;  %v41_v7 = vld [vmem:[#allocation2 + $0x8] sm:$0xff]  ;;  %v43_v9 = vld [vmem:[#allocation2 + $0x18] sm:$0xff]  ;;  %v66_v11 = vld [vmem:[#allocation5 + $0xb0] sm:$0xff]  ;;  %p251_p10 = scmp.ne.s32.totalorder %s159_s1, %s250_s21  ;;  %p256_p12 = scmp.lt.s32.totalorder %s250_s21, %s250_s21 }
  0x20   :  { %v67_v10 = vld [vmem:[#allocation5 + $0xb8] sm:$0xff]  ;;  %140 = vmatprep.mubr.f32.mxu0 %v41_v7  ;;  %145 = vmatprep.mubr.f32.mxu1 %v43_v9  ;;  %v65_v12 = vld [vmem:[#allocation5 + $0xa8] sm:$0xff]  ;;  %v64_v13 = vld [vmem:[#allocation5 + $0xa0] sm:$0xff] }
  0x21   :  { %v63_v14 = vld [vmem:[#allocation5 + $0x98] sm:$0xff]  ;;  %v62_v15 = vld [vmem:[#allocation5 + $0x90] sm:$0xff]  ;;  %v61_v16 = vld [vmem:[#allocation5 + $0x88] sm:$0xff]  ;;  %p257_p13 = por %p256_p12, %p255_p11 }
  0x22   :  { %79 = vmatpush1.xpose.msra.mxu0 %v72_v3  ;;  %188 = vmatpush1.xpose.msra.mxu1 %v72_v3  ;;  %v60_v17 = vld [vmem:[#allocation5 + $0x80] sm:$0xff]  ;;  %v59_v18 = vld [vmem:[#allocation5 + $0x78] sm:$0xff]  ;;  %v58_v19 = vld [vmem:[#allocation5 + $0x70] sm:$0xff] }
  0x23   :  { %80 = vmatprep.subr.mxu0 %v71_v4  ;;  %173 = vmatprep.subr.mxu1 %v71_v4  ;;  %v57_v20 = vld [vmem:[#allocation5 + $0x68] sm:$0xff]  ;;  %v56_v21 = vld [vmem:[#allocation5 + $0x60] sm:$0xff]  ;;  %v55_v22 = vld [vmem:[#allocation5 + $0x58] sm:$0xff]  ;;  %p258_p0 = pnand %p257_p13, %p251_p10 }
  0x24   :  { %v54_v23 = vld [vmem:[#allocation5 + $0x50] sm:$0xff]  ;;  %v53_v24 = vld [vmem:[#allocation5 + $0x48] sm:$0xff]  ;;  %v52_v25 = vld [vmem:[#allocation5 + $0x40] sm:$0xff] }
  0x25   :  { %v51_v26 = vld [vmem:[#allocation5 + $0x38] sm:$0xff]  ;;  %v50_v27 = vld [vmem:[#allocation5 + $0x30] sm:$0xff]  ;;  %v49_v28 = vld [vmem:[#allocation5 + $0x28] sm:$0xff] }
  0x26   :  { %81 = vmatpush1.xpose.msra.mxu0 %v70_v5  ;;  %189 = vmatpush1.xpose.msra.mxu1 %v70_v5  ;;  %v48_v29 = vld [vmem:[#allocation5 + $0x20] sm:$0xff]  ;;  %v47_v30 = vld [vmem:[#allocation5 + $0x18] sm:$0xff]  ;;  %v46_v31 = vld [vmem:[#allocation5 + $0x10] sm:$0xff] }
  0x27   :  { %82 = vmatprep.subr.mxu0 %v69_v6  ;;  %174 = vmatprep.subr.mxu1 %v69_v6  ;;  %v45_v32 = vld [vmem:[#allocation5 + $0x8] sm:$0xff]  ;;  %v44_v33 = vld [vmem:[#allocation5] sm:$0xff]  ;;  %v42_v35 = vld [vmem:[#allocation2 + $0x10] sm:$0xff] }
  0x28   :  { %v40_v34 = vld [vmem:[#allocation2] sm:$0xff] }
  0x2a   :  { %83 = vmatpush1.xpose.msra.mxu0 %v68_v8  ;;  %190 = vmatpush1.xpose.msra.mxu1 %v68_v8 }
  0x2b   :  { %84 = vmatprep.subr.mxu0 %v67_v10  ;;  %175 = vmatprep.subr.mxu1 %v67_v10 }
  0x2e   :  { %85 = vmatpush1.xpose.msra.mxu0 %v66_v11  ;;  %191 = vmatpush1.xpose.msra.mxu1 %v66_v11 }
  0x2f   :  { %86 = vmatprep.subr.mxu0 %v65_v12  ;;  %176 = vmatprep.subr.mxu1 %v65_v12 }
  0x32   :  { %87 = vmatpush1.xpose.msra.mxu0 %v64_v13  ;;  %192 = vmatpush1.xpose.msra.mxu1 %v64_v13 }
  0x33   :  { %88 = vmatprep.subr.mxu0 %v63_v14  ;;  %177 = vmatprep.subr.mxu1 %v63_v14 }
  0x36   :  { %89 = vmatpush1.xpose.msra.mxu0 %v62_v15  ;;  %193 = vmatpush1.xpose.msra.mxu1 %v62_v15 }
  0x37   :  { %90 = vmatprep.subr.mxu0 %v61_v16  ;;  %178 = vmatprep.subr.mxu1 %v61_v16 }
  0x3a   :  { %91 = vmatpush1.xpose.msra.mxu0 %v60_v17  ;;  %194 = vmatpush1.xpose.msra.mxu1 %v60_v17 }
  0x3b   :  { %92 = vmatprep.subr.mxu0 %v59_v18  ;;  %179 = vmatprep.subr.mxu1 %v59_v18 }
  0x3e   :  { %93 = vmatpush1.xpose.msra.mxu0 %v58_v19  ;;  %195 = vmatpush1.xpose.msra.mxu1 %v58_v19 }
  0x3f   :  { %94 = vmatprep.subr.mxu0 %v57_v20  ;;  %180 = vmatprep.subr.mxu1 %v57_v20 }
  0x42   :  { %95 = vmatpush1.xpose.msra.mxu0 %v56_v21  ;;  %196 = vmatpush1.xpose.msra.mxu1 %v56_v21 }
  0x43   :  { %96 = vmatprep.subr.mxu0 %v55_v22  ;;  %181 = vmatprep.subr.mxu1 %v55_v22 }
  0x46   :  { %97 = vmatpush1.xpose.msra.mxu0 %v54_v23  ;;  %197 = vmatpush1.xpose.msra.mxu1 %v54_v23 }
  0x47   :  { %98 = vmatprep.subr.mxu0 %v53_v24  ;;  %182 = vmatprep.subr.mxu1 %v53_v24 }
  0x4a   :  { %99 = vmatpush1.xpose.msra.mxu0 %v52_v25  ;;  %198 = vmatpush1.xpose.msra.mxu1 %v52_v25 }
  0x4b   :  { %100 = vmatprep.subr.mxu0 %v51_v26  ;;  %183 = vmatprep.subr.mxu1 %v51_v26 }
  0x4e   :  { %101 = vmatpush1.xpose.msra.mxu0 %v50_v27  ;;  %199 = vmatpush1.xpose.msra.mxu1 %v50_v27 }
  0x4f   :  { %102 = vmatprep.subr.mxu0 %v49_v28  ;;  %184 = vmatprep.subr.mxu1 %v49_v28 }
  0x52   :  { %103 = vmatpush1.xpose.msra.mxu0 %v48_v29  ;;  %200 = vmatpush1.xpose.msra.mxu1 %v48_v29 }
  0x53   :  { %104 = vmatprep.subr.mxu0 %v47_v30  ;;  %185 = vmatprep.subr.mxu1 %v47_v30 }
  0x56   :  { %105 = vmatpush1.xpose.msra.mxu0 %v46_v31  ;;  %201 = vmatpush1.xpose.msra.mxu1 %v46_v31 }
  0x57   :  { %106 = vmatprep.subr.mxu0 %v45_v32  ;;  %186 = vmatprep.subr.mxu1 %v45_v32 }
  0x5a   :  { %107 = vmatpush1.xpose.msra.mxu0 %v44_v33  ;;  %202 = vmatpush1.xpose.msra.mxu1 %v44_v33 }
  0x5d   :  { %141 = vmatmul.mubr.f32.vlgmr.msra.gmra.mxu0 %v40_v34  ;;  %146 = vmatmul.mubr.f32.vlgmr.msra.gmra.mxu1 %v42_v35 }
 0x11d   :  { %v142_v36 = vpop.f32.mrf.mxu0  ;;  %v147_v37 = vpop.f32.mrf.mxu1 }
 0x11e   :  { %151 = vst [vmem:[#allocation7] sm:$0xff] %v142_v36  ;;  %152 = vst [vmem:[#allocation7 + $0x8] sm:$0xff] %v147_v37 }
 0x11f   :  { %v144_v38 = vpop.f32.mrf.mxu0  ;;  %v149_v39 = vpop.f32.mrf.mxu1 }
 0x120   :  { %261 = shalt.err (!%p258_p0)
}
 0x121   :  { %s281_s22 = smov 128   ;;  %s282_s23 = smov 8  }
 0x122   :  { %164 = dma.vmem_to_hbm [thread:$0]  %s159_s1, 256, %s309_s2, [#allocation4], %s281_s22, %s281_s22, %s282_s23  }
 0x123   :  { %274 = dma.done.wait [#allocation4], 256  }
 0x124   :  { %275 = vsyncadd [#allocation4], 4294967040 }
 0x125   :  { %168 = vsyncpa [#allocation3], 1 }
 0x126   :  { %169 = vsyncpa [#allocation6], 1 }
 0x127   :  { %170 = vsyncpa [#allocation4], 1 }

</bundles_post_ra>
